<compile_context>
chip_gen: v7x
topology: tpu7x:2x2x1
jax: 0.10.0
libtpu: 0.0.40
codegen_flags: <defaults>
</compile_context>

<pallas_src>
import functools

import jax
import jax.numpy as jnp
from jax.experimental import pallas as pl
from jax.experimental.pallas import tpu as pltpu


def _round_up(n, m):
    return (n + m - 1) // m * m


# ----------------------------------------------------------------- kernel ----

def _channel_attn_kernel(x_ref, w1_ref, w2_ref, g_ref, o_ref, *, hw_true):
    """selfchannelbranch forward for one batch element.

    x_ref : (1, Cp, HWp) f32  padded activations (channels x flattened spatial)
    w1_ref: (C6, Cp)     f32  fc1 weight (1x1 conv, bias=False)
    w2_ref: (Cp, C6)     f32  fc2 weight (1x1 conv, bias=False)
    g_ref : (1, 1)       f32  gamma2
    o_ref : (1, Cp, HWp) f32
    """
    x = x_ref[0]                                          # (Cp, HWp)
    hwp = x.shape[-1]

    # ---- global max / avg pooling over the true spatial extent --------------
    if hw_true == hwp:                                    # static: no padding
        mx = jnp.max(x, axis=-1, keepdims=True)           # (Cp, 1)
        sm = jnp.sum(x, axis=-1, keepdims=True)
    else:
        col = jax.lax.broadcasted_iota(jnp.int32, x.shape, 1)
        valid = col < hw_true
        mx = jnp.max(jnp.where(valid, x, jnp.float32(-3.4e38)), axis=-1, keepdims=True)
        sm = jnp.sum(jnp.where(valid, x, 0.0), axis=-1, keepdims=True)
    avg = sm * jnp.float32(1.0 / hw_true)

    # ---- shared MLP on the stacked (max | avg) RHS: one matmul per layer -----
    sel = jax.lax.broadcasted_iota(jnp.int32, (x.shape[0], 2), 1)
    pooled = jnp.where(sel == 0, mx, avg)                 # (Cp, 2): [max, avg]
    h = jnp.maximum(
        jnp.dot(w1_ref[...], pooled, preferred_element_type=jnp.float32), 0.0)  # (C6, 2)
    o = jnp.dot(w2_ref[...], h, preferred_element_type=jnp.float32)             # (Cp, 2)
    # ReLU is elementwise, so summing the two columns equals
    # fc2(relu(fc1(max_pool))) + fc2(relu(fc1(avg_pool))).
    out2 = jax.nn.sigmoid(jnp.sum(o, axis=-1, keepdims=True))                   # (Cp, 1)

    # ---- out = x + gamma2 * out2 * x  ==  x * (1 + gamma2 * out2) ------------
    o_ref[0] = x * (1.0 + g_ref[...] * out2)


# ------------------------------------------------------------------ wrapper ----

def selfchannelbranch_forward(x, w1, w2, gamma2):
    """x: (B, C, H, W); w1: (C//6, C); w2: (C, C//6); gamma2: scalar."""
    b, c, h, w = x.shape
    c6 = w1.shape[0]
    hw = h * w
    cp = _round_up(c, 8)          # sublane granule
    hwp = _round_up(hw, 128)      # lane-dense

    xf = x.reshape(b, c, hw).astype(jnp.float32)
    if (cp, hwp) != (c, hw):
        xf = jnp.pad(xf, ((0, 0), (0, cp - c), (0, hwp - hw)))
    w1p = jnp.pad(w1.astype(jnp.float32), ((0, 0), (0, cp - c)))
    w2p = jnp.pad(w2.astype(jnp.float32), ((0, cp - c), (0, 0)))
    g = jnp.reshape(jnp.asarray(gamma2, jnp.float32), (1, 1))

    out = pl.pallas_call(
        functools.partial(_channel_attn_kernel, hw_true=hw),
        out_shape=jax.ShapeDtypeStruct((b, cp, hwp), jnp.float32),
        grid_spec=pltpu.PrefetchScalarGridSpec(
            num_scalar_prefetch=0,
            grid=(b,),
            in_specs=[
                pl.BlockSpec((1, cp, hwp), lambda i: (i, 0, 0)),
                pl.BlockSpec((c6, cp), lambda i: (0, 0)),
                pl.BlockSpec((cp, c6), lambda i: (0, 0)),
                pl.BlockSpec((1, 1), lambda i: (0, 0)),
            ],
            out_specs=pl.BlockSpec((1, cp, hwp), lambda i: (i, 0, 0)),
        ),
        compiler_params=pltpu.CompilerParams(
            dimension_semantics=("parallel",)),
    )(xf, w1p, w2p, g)

    return out[:, :c, :hw].reshape(b, c, h, w)


# ---------------------------------------------------------------- reference ----

def _reference(x, w1, w2, gamma2):
    avg = jnp.mean(x, axis=(2, 3), keepdims=True)
    mx = jnp.max(x, axis=(2, 3), keepdims=True)

    def mlp(v):
        hmid = jnp.maximum(jnp.einsum('oc,bcij->boij', w1, v), 0.0)
        return jnp.einsum('co,boij->bcij', w2, hmid)

    out2 = jax.nn.sigmoid(mlp(mx) + mlp(avg))
    return x + gamma2 * out2 * x


# --------------------------------------------------------------------- main ----

if __name__ == "__main__":
    key = jax.random.PRNGKey(0)

    def run_case(b, c, hgt, wdt, seed_keys):
        kx, k1, k2 = seed_keys
        x = jax.random.normal(kx, (b, c, hgt, wdt), jnp.float32)
        w1 = 0.05 * jax.random.normal(k1, (c // 6, c), jnp.float32)   # fc1 1x1 conv
        w2 = 0.05 * jax.random.normal(k2, (c, c // 6), jnp.float32)   # fc2 1x1 conv
        # torch initializes gamma2 to 0 (output == input); use a nonzero value
        # so the attention path is actually exercised in this test.
        gamma2 = jnp.float32(0.25)

        out = selfchannelbranch_forward(x, w1, w2, gamma2)
        jax.block_until_ready(out)
        ref = _reference(x, w1, w2, gamma2)

        assert out.shape == (b, c, hgt, wdt), out.shape
        assert bool(jnp.all(jnp.isfinite(out)))
        err = float(jnp.max(jnp.abs(out - ref)))
        assert bool(jnp.allclose(out, ref, rtol=1e-5, atol=1e-5)), err

    keys = jax.random.split(key, 6)
    # lane-dense case: B=2, C=48 (divisible by 6 and 8), 16x16 -> HW=256
    run_case(2, 48, 16, 16, keys[0:3])
    # ragged case exercising channel + spatial padding and the pooling mask:
    # C=30 -> pad to 32, HW=49 -> pad to 128
    run_case(1, 30, 7, 7, keys[3:6])

    print("KERNEL_OK")
</pallas_src>

<mosaic_0001>
module attributes {stable_mosaic.version = 11 : i64} {
  func.func @_channel_attn_kernel(%arg0: i32, %arg1: memref<1x48x256xf32, #tpu.memory_space<vmem>>, %arg2: memref<8x48xf32, #tpu.memory_space<vmem>>, %arg3: memref<48x8xf32, #tpu.memory_space<vmem>>, %arg4: memref<1x1xf32, #tpu.memory_space<vmem>>, %arg5: memref<1x48x256xf32, #tpu.memory_space<vmem>>) attributes {dimension_semantics = [#tpu.dimension_semantics<parallel>], iteration_bounds = array<i64: 2>, scalar_prefetch = 0 : i64, scratch_operands = 0 : i64, tpu.core_type = #tpu.core_type<tc>, window_params = [{transform_indices = @transform_0, window_bounds = array<i64: 1, 48, 256>}, {pipeline_mode = #tpu.pipeline_mode<synchronous>, transform_indices = @transform_1, window_bounds = array<i64: 8, 48>}, {pipeline_mode = #tpu.pipeline_mode<synchronous>, transform_indices = @transform_2, window_bounds = array<i64: 48, 8>}, {pipeline_mode = #tpu.pipeline_mode<synchronous>, transform_indices = @transform_3, window_bounds = array<i64: 1, 1>}, {transform_indices = @transform_4, window_bounds = array<i64: 1, 48, 256>}]} {
    %c0 = arith.constant 0 : index
    %c0_0 = arith.constant 0 : index
    %c0_1 = arith.constant 0 : index
    %0 = vector.load %arg1[%c0, %c0_0, %c0_1] : memref<1x48x256xf32, #tpu.memory_space<vmem>>, vector<1x48x256xf32>
    %1 = vector.shape_cast %0 : vector<1x48x256xf32> to vector<48x256xf32>
    %cst = arith.constant dense<0xFF800000> : vector<48xf32>
    %2 = vector.multi_reduction <maximumf>, %1, %cst [1] : vector<48x256xf32> to vector<48xf32>
    %3 = vector.shape_cast %2 : vector<48xf32> to vector<48x1xf32>
    %cst_2 = arith.constant dense<0.000000e+00> : vector<48xf32>
    %4 = vector.multi_reduction <add>, %1, %cst_2 [1] : vector<48x256xf32> to vector<48xf32>
    %5 = vector.shape_cast %4 : vector<48xf32> to vector<48x1xf32>
    %cst_3 = arith.constant 3.906250e-03 : f32
    %6 = vector.broadcast %cst_3 : f32 to vector<48x1xf32>
    %7 = arith.mulf %5, %6 : vector<48x1xf32>
    %8 = tpu.iota {dimensions = array<i32: 1>} : vector<48x2xi32>
    %c0_i32 = arith.constant 0 : i32
    %9 = vector.broadcast %c0_i32 : i32 to vector<48x2xi32>
    %10 = arith.cmpi eq, %8, %9 : vector<48x2xi32>
    %11 = vector.shape_cast %3 : vector<48x1xf32> to vector<48x1xf32>
    %12 = vector.broadcast %11 : vector<48x1xf32> to vector<48x2xf32>
    %13 = vector.shape_cast %7 : vector<48x1xf32> to vector<48x1xf32>
    %14 = vector.broadcast %13 : vector<48x1xf32> to vector<48x2xf32>
    %15 = arith.select %10, %12, %14 : vector<48x2xi1>, vector<48x2xf32>
    %c0_4 = arith.constant 0 : index
    %c0_5 = arith.constant 0 : index
    %16 = vector.load %arg2[%c0_4, %c0_5] : memref<8x48xf32, #tpu.memory_space<vmem>>, vector<8x48xf32>
    %cst_6 = arith.constant dense<0.000000e+00> : vector<8x2xf32>
    %17 = tpu.matmul %16, %15, %cst_6 {dimension_numbers = #tpu.dot_dimension_numbers<[1], [0], [0], [1], [0, 0, 1, 1], [], []>} : vector<8x48xf32>, vector<48x2xf32>, vector<8x2xf32> -> vector<8x2xf32>
    %cst_7 = arith.constant 0.000000e+00 : f32
    %18 = vector.broadcast %cst_7 : f32 to vector<8x2xf32>
    %19 = arith.maximumf %17, %18 : vector<8x2xf32>
    %c0_8 = arith.constant 0 : index
    %c0_9 = arith.constant 0 : index
    %20 = vector.load %arg3[%c0_8, %c0_9] : memref<48x8xf32, #tpu.memory_space<vmem>>, vector<48x8xf32>
    %cst_10 = arith.constant dense<0.000000e+00> : vector<48x2xf32>
    %21 = tpu.matmul %20, %19, %cst_10 {dimension_numbers = #tpu.dot_dimension_numbers<[1], [0], [0], [1], [0, 0, 1, 1], [], []>} : vector<48x8xf32>, vector<8x2xf32>, vector<48x2xf32> -> vector<48x2xf32>
    %cst_11 = arith.constant dense<0.000000e+00> : vector<48xf32>
    %22 = vector.multi_reduction <add>, %21, %cst_11 [1] : vector<48x2xf32> to vector<48xf32>
    %23 = vector.shape_cast %22 : vector<48xf32> to vector<48x1xf32>
    %24 = arith.negf %23 : vector<48x1xf32>
    %25 = math.exp %24 : vector<48x1xf32>
    %cst_12 = arith.constant 1.000000e+00 : f32
    %26 = vector.broadcast %cst_12 : f32 to vector<48x1xf32>
    %27 = arith.addf %26, %25 : vector<48x1xf32>
    %28 = arith.divf %26, %27 : vector<48x1xf32>
    %c0_13 = arith.constant 0 : index
    %c0_14 = arith.constant 0 : index
    %29 = vector.load %arg4[%c0_13, %c0_14] : memref<1x1xf32, #tpu.memory_space<vmem>>, vector<1x1xf32>
    %30 = vector.broadcast %29 : vector<1x1xf32> to vector<48x1xf32>
    %31 = arith.mulf %30, %28 : vector<48x1xf32>
    %cst_15 = arith.constant 1.000000e+00 : f32
    %32 = vector.broadcast %cst_15 : f32 to vector<48x1xf32>
    %33 = arith.addf %32, %31 : vector<48x1xf32>
    %34 = vector.broadcast %33 : vector<48x1xf32> to vector<48x256xf32>
    %35 = arith.mulf %1, %34 : vector<48x256xf32>
    %c0_16 = arith.constant 0 : index
    %c0_17 = arith.constant 0 : index
    %c0_18 = arith.constant 0 : index
    %36 = vector.load %arg5[%c0_16, %c0_17, %c0_18] : memref<1x48x256xf32, #tpu.memory_space<vmem>>, vector<1x48x256xf32>
    %37 = vector.shape_cast %36 : vector<1x48x256xf32> to vector<48x256xf32>
    %38 = vector.shape_cast %35 : vector<48x256xf32> to vector<1x48x256xf32>
    tpu.vector_store %arg5[%c0_16, %c0_17, %c0_18], %38 {strides = array<i32>} : memref<1x48x256xf32, #tpu.memory_space<vmem>>, vector<1x48x256xf32>,
    return
  }
  func.func @transform_0(%arg0: i32) -> (i32, i32, i32) {
    %c0_i32 = arith.constant 0 : i32
    %c0_i32_0 = arith.constant 0 : i32
    %c0_i32_1 = arith.constant 0 : i32
    return %arg0, %c0_i32, %c0_i32_0 : i32, i32, i32
  }
  func.func @transform_1(%arg0: i32) -> (i32, i32) {
    %c0_i32 = arith.constant 0 : i32
    %c0_i32_0 = arith.constant 0 : i32
    %c0_i32_1 = arith.constant 0 : i32
    return %c0_i32, %c0_i32_0 : i32, i32
  }
  func.func @transform_2(%arg0: i32) -> (i32, i32) {
    %c0_i32 = arith.constant 0 : i32
    %c0_i32_0 = arith.constant 0 : i32
    %c0_i32_1 = arith.constant 0 : i32
    return %c0_i32, %c0_i32_0 : i32, i32
  }
  func.func @transform_3(%arg0: i32) -> (i32, i32) {
    %c0_i32 = arith.constant 0 : i32
    %c0_i32_0 = arith.constant 0 : i32
    %c0_i32_1 = arith.constant 0 : i32
    return %c0_i32, %c0_i32_0 : i32, i32
  }
  func.func @transform_4(%arg0: i32) -> (i32, i32, i32) {
    %c0_i32 = arith.constant 0 : i32
    %c0_i32_0 = arith.constant 0 : i32
    %c0_i32_1 = arith.constant 0 : i32
    return %arg0, %c0_i32, %c0_i32_0 : i32, i32, i32
  }
}

</mosaic_0001>

<bundles_post_ra>
// kernel: tpu_custom_call.1
= control target key start
LH: loop header
LB: loop body
LE: loop exit
PB: predicated region body
PF: predicated region fallthrough
CT: control target
= control target key end

     0   :  { %s1242_s0 = inlined_call_operand.hbm [shape: f32[2,48,256], index: 0, kind: input, shape index: {}]   ;;  %s1243_s1 = inlined_call_operand.vmem [shape: f32[8,48], index: 1, kind: input, shape index: {}]   ;;  %s1244_s2 = inlined_call_operand.vmem [shape: f32[48,8], index: 2, kind: input, shape index: {}]   ;;  %s1245_s3 = inlined_call_operand.<no memory space> [shape: f32[1,1], index: 3, kind: input, shape index: {}]   ;;  %s1246_s4 = inlined_call_operand.hbm [shape: f32[2,48,256], index: 4, kind: output, shape index: {}]  }
   0x1   :  { %v9_v0 = vstv %s1245_s3 }
   0x2   :  { %10 = vst [vmem:[#allocation2] sm:$0x1] %v9_v0 }
   0x3   :  { %11 = vsyncpa [#allocation4], 0 }
   0x4   :  { %13 = vsyncpa [#allocation4 + $0x1], 0 }
   0x5   :  { %14 = vsyncpa [#allocation5], 0 }
   0x6   :  { %16 = vsyncpa [#allocation5 + $0x1], 0  ;;  %s983_s17 = smov 0   ;;  %s985_s18 = smov 0  }
   0x7   :  { %s987_s19 = smov 0   ;;  %s989_s20 = smov 0  }
   0x8 LB: > { %s1004_s3 = sadd.s32 4294967295, %s943_s20   ;;  %s692_s21 = sadd.s32 4294967294, %s943_s20   ;;  %s943_s20 = sphi %s989_s20, %s1258_s20   ;;  %s939_s19 = sphi %s987_s19, %s1257_s19   ;;  %s935_s18 = sphi %s985_s18, %s1256_s18   ;;  %s931_s17 = sphi %s983_s17, %s1255_s17  }
   0x9   : > { %s1008_s22 = sadd.s32 1, %s943_s20   ;;  %s29_s23 = sadd.s32 1, %s939_s19 }
   0xa   : > { %s26_s24 = ssub.s32 %s943_s20, %s1008_s22  ;;  %p36_p0 = scmp.ne.s32.totalorder %s939_s19, %s935_s18 }
   0xb   : > { %p27_p1 = scmp.eq.s32.totalorder %s26_s24, 0  ;;  %p37_p2 = scmp.eq.s32.totalorder %s943_s20, 0 }
   0xc   : > { %p42_p3 = scmp.ne.s32.totalorder %s935_s18, %s931_s17  ;;  %p43_p4 = scmp.eq.s32.totalorder %s1004_s3, 0 }
   0xd   : > { %s1020_s25 = scalar_select %p27_p1, %s939_s19, %s29_s23  }
   0xe   : > { %p38_p5 = por %p37_p2, %p36_p0  ;;  %p1022_p6 = por %p43_p4, %p42_p3 }
   0xf   : > { %p129_p7 = scmp.eq.s32.totalorder %s1004_s3, 1  ;;  %p135_p8 = scmp.eq.s32.totalorder %s692_s21, 1 }
  0x10   : > { %p779_p10 = scmp.lt.s32.totalorder %s943_s20, 2  ;;  %s164_s29 = sand.u32 1, %s939_s19  }
  0x11   : > { %p1029_p11 = por %p129_p7, %p36_p0  ;;  %p1033_p12 = por %p135_p8, %p42_p3 }
  0x12   : > { %s764_s30 = smul.u32 1536, %s943_s20  ;;  %p1044_p13 = pnand %p779_p10, %p38_p5 }
  0x13   : > { %s1249_s27 = scalar_select %p1029_p11, 1, 0 }
  0x14   : > { %s1250_s28 = scalar_select %p1033_p12, 1, 0 }
  0x15   : > { %s763_s5 = smul.u32 96, %s164_s29  ;;  %s1042_s8 = scalar_lea.hbm %s1242_s0, %s764_s30 }
  0x16   : > { %s1050_s12 = scalar_lea.sflag [#allocation4], %s164_s29  ;;  %s847_s13 = scalar_lea.hbm %s1042_s8, 1536 }
  0x17   : > { %s168_s10 = scalar_lea.vmem [#allocation3], %s763_s5  ;;  %p848_p0 = scmp.ne.s32.totalorder %s1042_s8, %s847_s13 }
  0x18   : > { %s175_s11 = sshll.u32 %s168_s10, 4  ;;  %p849_p1 = pneg %p1044_p13  ;;  %s1048_s11 = int_to_ptr.vmem [resolvable:$true] %s175_s11 }
  0x19   : > { %s852_s16 = scalar_lea.hbm %s1242_s0, 3072  ;;  %p853_p4 = scmp.lt.u32.totalorder %s1042_s8, %s1242_s0 }
  0x1a   : > { %p850_p2 = pnand %p849_p1, %p848_p0  ;;  %p854_p5 = scmp.lt.u32.totalorder %s852_s16, %s847_s13 }
  0x1b   : > { %p856_p8 = scmp.lt.u32.totalorder %s847_s13, %s1042_s8 }
  0x1c   : > { %p851_p3 = pneg %p850_p2  ;;  %p855_p7 = por %p854_p5, %p853_p4 }
  0x1e   : > { %p857_p10 = por %p856_p8, %p855_p7 }
  0x20   : > { %p858_p9 = pnand %p857_p10, %p851_p3 }
  0x22   : > { %861 = shalt.err (!%p858_p9)
}
  0x23   : > { %s862_s24 = scalar_lea.vmem %s1048_s11, 1536  ;;  %s945_s29 = smov [#allocation3]  }
  0x24   : > { %p863_p0 = scmp.ne.s32.totalorder %s1048_s11, %s862_s24  ;;  %s867_s30 = sshll.u32 %s945_s29, 4  ;;  %s868_s30 = int_to_ptr.vmem [resolvable:$false] %s867_s30 }
  0x25   : > { %s869_s5 = scalar_lea.vmem %s868_s30, 3072  ;;  %p870_p11 = scmp.lt.s32.totalorder %s1048_s11, %s868_s30 }
  0x26   : > { %p865_p2 = pnand %p863_p0, %p849_p1  ;;  %p871_p4 = scmp.lt.s32.totalorder %s869_s5, %s862_s24 }
  0x28   : > { %p866_p12 = pneg %p865_p2  ;;  %p872_p5 = por %p871_p4, %p870_p11 }
  0x2a   : > { %p873_p7 = pnand %p872_p5, %p866_p12 }
  0x2c   : > { %876 = shalt.err (!%p873_p7)
}
  0x2d   : > { %s946_s6 = smov 256   ;;  %s947_s7 = smov 16  }
  0x2e   : > { %774 = dma.hbm_to_vmem [thread:$0]  (!%p1044_p13), %s1042_s8, 1536, %s1048_s11, %s1050_s12, %s946_s6, %s946_s6, %s947_s7  }
  0x2f   : > { %p696_p9 = scmp.ge.s32.totalorder %s943_s20, 1  ;;  %p183_p1 = scmp.lt.s32.totalorder %s943_s20, 3 }
  0x31   : > { %p184_p3 = pnand %p696_p9, %p183_p1 }
  0x32   : > { %s1081_s10 = sand.u32 (!%p184_p3), 1, %s935_s18  }
  0x33   : > { %187 = sbr.rel (%p184_p3) target bundleno = 992 (0x3e0), region = 36  ;;  %s190_s14 = scalar_lea.sflag (!%p184_p3), [#allocation4], %s1081_s10 }
  0x34   : > { %s765_s13 = smul.u32 (!%p184_p3), 96, %s1081_s10 }
  0x36   : > { %s193_s15 = scalar_lea.vmem (!%p184_p3), [#allocation3], %s765_s13 }
  0x3a   : > { %922 = dma.done.wait (%p1022_p6), %s190_s14, 1536  }
  0x3b   : > { %924 = vsyncadd (%p1022_p6), %s190_s14, 4294965760  ;;  %v1091_v1 = vld [vmem:[%s193_s15] sm:$0xff]  ;;  %v1093_v2 = vld [vmem:[%s193_s15 + $0x8] sm:$0xff]  ;;  %v948_v25 = vmov 0.0|0.0   ;;  %vm949_vm0 = vmmov 0   ;;  %v950_v26 = vmov 0.0   ;;  %v272_v27 = vlaneseq }
  0x3c   : > { %v1095_v3 = vld [vmem:[%s193_s15 + $0x10] sm:$0xff]  ;;  %v248_v4 = vadd.f32 %v1093_v2, %v1091_v1  ;;  %v230_v5 = vmax.f32 %v1091_v1, %v1093_v2  ;;  %v1101_v6 = vld [vmem:[%s193_s15 + $0x18] sm:$0xff]  ;;  %v1107_v9 = vld [vmem:[%s193_s15 + $0x20] sm:$0xff]  ;;  %754 = vmatprep.subr.bf16.mxu0 %v948_v25  ;;  %740 = vmatprep.mubr.msk.f32.mxu0 %vm949_vm0, %v950_v26  ;;  %vm282_vm2 = vcmask 392192   ;;  %vm363_vm3 = vcmask 64512   ;;  %s217_s14 = scalar_lea.vmem [#allocation6], %s765_s13 }
  0x3d   : > { %v251_v7 = vadd.f32 %v1101_v6, %v1095_v3  ;;  %v233_v8 = vmax.f32 %v1095_v3, %v1101_v6  ;;  %v1109_v10 = vld [vmem:[%s193_s15 + $0x28] sm:$0xff]  ;;  %v1111_v11 = vld [vmem:[%s193_s15 + $0x30] sm:$0xff]  ;;  %v1113_v12 = vld [vmem:[%s193_s15 + $0x38] sm:$0xff]  ;;  %v273_v29 = vand.u32 127, %v272_v27  ;;  %vm477_vm4 = vcmask 15360   ;;  %s766_s13 = smul.u32 1536, %s1004_s3 }
  0x3e   : > { %249 = vadd.xlane.f32.xlu0 %v248_v4  ;;  %231 = vmax.xlane.f32.xlu1 %v230_v5  ;;  %v254_v13 = vadd.f32 %v1109_v10, %v1107_v9  ;;  %v257_v14 = vadd.f32 %v1113_v12, %v1111_v11  ;;  %v236_v15 = vmax.f32 %v1107_v9, %v1109_v10  ;;  %v1123_v17 = vld [vmem:[%s193_s15 + $0x40] sm:$0xff]  ;;  %v1125_v18 = vld [vmem:[%s193_s15 + $0x48] sm:$0xff]  ;;  %v1127_v19 = vld [vmem:[%s193_s15 + $0x50] sm:$0xff]  ;;  %v951_v26 = vmov 0   ;;  %s606_s3 = scalar_lea.sflag [#allocation5], %s1081_s10  ;;  %p1252_p11 = scmp.ne.s32.totalorder %s1249_s27, 0 }
  0x3f   : > { %v239_v16 = vmax.f32 %v1111_v11, %v1113_v12  ;;  %v1129_v20 = vld [vmem:[%s193_s15 + $0x58] sm:$0xff]  ;;  %v260_v21 = vadd.f32 %v1125_v18, %v1123_v17  ;;  %v242_v23 = vmax.f32 %v1123_v17, %v1125_v18  ;;  %vm274_vm1 = vcmp.eq.s32.totalorder %v273_v29, 0  ;;  %v358_v61 = vld [vmem:[%s1244_s2 + $0x8] sm:$0xff]  ;;  %v359_v62 = vld [vmem:[%s1244_s2 + $0x10] sm:$0xff]  ;;  %822 = vset.pattern.permute.xlu1 %v951_v26  ;;  %821 = vset.pattern.permute.xlu0 %v951_v26  ;;  %s619_s15 = sshll.u32 %s217_s14, 4  ;;  %s1194_s9 = scalar_lea.hbm %s1246_s4, %s766_s13  ;;  %s1196_s15 = int_to_ptr.vmem [resolvable:$true] %s619_s15 }
  0x40   : > { %v263_v22 = vadd.f32 %v1129_v20, %v1127_v19  ;;  %v245_v24 = vmax.f32 %v1127_v19, %v1129_v20  ;;  %v281_v56 = vld [vmem:[%s1243_s1] sm:$0xff]  ;;  %v360_v63 = vld [vmem:[%s1244_s2 + $0x18] sm:$0xff]  ;;  %v362_v4 = vld [vmem:[%s1244_s2 + $0x28] sm:$0xff]  ;;  %s877_s11 = scalar_lea.vmem %s1196_s15, 1536  ;;  %s952_s12 = smov [#allocation6]  }
  0x41   : > { %v357_v57 = vld [vmem:[%s1244_s2] sm:$0xff]  ;;  %p878_p6 = scmp.ne.s32.totalorder %s1196_s15, %s877_s11  ;;  %s881_s16 = sshll.u32 %s952_s12, 4  ;;  %s882_s16 = int_to_ptr.vmem [resolvable:$false] %s881_s16 }
  0x42   : > { %252 = vadd.xlane.f32.xlu0 %v251_v7  ;;  %234 = vmax.xlane.f32.xlu1 %v233_v8  ;;  %v361_v0 = vld [vmem:[%s1244_s2 + $0x20] sm:$0xff]  ;;  %s883_s21 = scalar_lea.vmem %s882_s16, 3072  ;;  %p884_p8 = scmp.lt.s32.totalorder %s1196_s15, %s882_s16 }
  0x43   : > { %745 = vmatprep.mubr.msk.f32.mxu1 %vm363_vm3, %v357_v57  ;;  %p879_p12 = pnand %p878_p6, %p1252_p11  ;;  %p885_p10 = scmp.lt.s32.totalorder %s883_s21, %s877_s11 }
  0x45   : > { %p880_p13 = pneg %p879_p12  ;;  %p886_p0 = por %p885_p10, %p884_p8 }
  0x46   : > { %255 = vadd.xlane.f32.xlu0 %v254_v13  ;;  %258 = vadd.xlane.f32.xlu1 %v257_v14 }
  0x47   : > { %p887_p2 = pnand %p886_p0, %p880_p13 }
  0x4a   : > { %237 = vmax.xlane.f32.xlu0 %v236_v15  ;;  %240 = vmax.xlane.f32.xlu1 %v239_v16 }
  0x4e   : > { %261 = vadd.xlane.f32.xlu0 %v260_v21  ;;  %264 = vadd.xlane.f32.xlu1 %v263_v22 }
  0x52   : > { %243 = vmax.xlane.f32.xlu0 %v242_v23  ;;  %246 = vmax.xlane.f32.xlu1 %v245_v24 }
  0xcb   : > { %v250_v28 = vpop.xlane.xlu0 %249  ;;  %v232_v30 = vpop.xlane.xlu1 %231 }
  0xcc   : > { %v266_v31 = vmul.f32 0.00390625, %v250_v28 }
  0xce   : > { %v275_v35 = vsel %vm274_vm1, %v232_v30, %v266_v31 }
  0xcf   : > { %v253_v32 = vpop.xlane.xlu0 %252  ;;  %v235_v33 = vpop.xlane.xlu1 %234 }
  0xd0   : > { %v267_v34 = vmul.f32 0.00390625, %v253_v32 }
  0xd2   : > { %v276_v36 = vsel %vm274_vm1, %v235_v33, %v267_v34 }
  0xd3   : > { %v256_v37 = vpop.xlane.xlu0 %255  ;;  %v259_v38 = vpop.xlane.xlu1 %258  ;;  %v755_v39 = vpack.c.bf16 %v276_v36, %v275_v35 }
  0xd4   : > { %v268_v40 = vmul.f32 0.00390625, %v256_v37  ;;  %v269_v41 = vmul.f32 0.00390625, %v259_v38 }
  0xd5   : > { %756 = vmatpush3.bf16.msra.mxu0 %v755_v39 }
  0xd6   : > { %757 = vmatprep.subr.bf16.mxu0 %v948_v25 }
  0xd7   : > { %v238_v42 = vpop.xlane.xlu0 %237  ;;  %v241_v43 = vpop.xlane.xlu1 %240 }
  0xd8   : > { %v277_v44 = vsel %vm274_vm1, %v238_v42, %v268_v40  ;;  %v278_v45 = vsel %vm274_vm1, %v241_v43, %v269_v41 }
  0xd9   : > { %v758_v46 = vpack.c.bf16 %v278_v45, %v277_v44 }
  0xdb   : > { %v262_v47 = vpop.xlane.xlu0 %261  ;;  %759 = vmatpush3.bf16.msra.mxu0 %v758_v46  ;;  %v265_v48 = vpop.xlane.xlu1 %264 }
  0xdc   : > { %760 = vmatprep.subr.bf16.mxu0 %v948_v25  ;;  %v270_v49 = vmul.f32 0.00390625, %v262_v47  ;;  %v271_v50 = vmul.f32 0.00390625, %v265_v48 }
  0xdf   : > { %v244_v51 = vpop.xlane.xlu0 %243  ;;  %v247_v52 = vpop.xlane.xlu1 %246 }
  0xe0   : > { %v279_v53 = vsel %vm274_vm1, %v244_v51, %v270_v49  ;;  %v280_v54 = vsel %vm274_vm1, %v247_v52, %v271_v50  ;;  %v710_v51 = vld [vmem:[#allocation2] ss:$0 sm:$0xff] }
  0xe1   : > { %v761_v55 = vpack.c.bf16 %v280_v54, %v279_v53 }
  0xe3   : > { %762 = vmatpush3.bf16.msra.mxu0 %v761_v55 }
  0xe6   : > { %741 = vmatmul.mubr.msk.f32.vlgmr.msra.gmra.mrb[0].mxu0 %vm282_vm2, %v281_v56 }
 0x1b9   : > { %v352_v58 = vpop.f32.mrb[0].mxu0 }
 0x1ba   : > { %v356_v59 = vmax.f32 %v352_v58, 0.0  ;;  %v742_v60 = vpop.f32.mrb[1].mxu0 }
 0x1bc   : > { %743 = vmatprep.subr.mxu1 %v356_v59 }
 0x1bd   : > { %744 = vmatpush3.msra.mxu1 %v356_v59 }
 0x1be   : > { %746 = vmatmul.mubr.msk.f32.vlgmr.msra.gmra.mrb[0].mxu1 %vm363_vm3, %v358_v61 }
 0x1bf   : > { %748 = vmatprep.mubr.msk.f32.mxu1 %vm363_vm3, %v359_v62 }
 0x1c2   : > { %749 = vmatmul.mubr.msk.f32.gmra.mrb[2].mxu1 %vm363_vm3, %v360_v63 }
 0x1c3   : > { %751 = vmatprep.mubr.msk.f32.mxu1 %vm363_vm3, %v361_v0 }
 0x1c6   : > { %752 = vmatmul.mubr.msk.f32.gmra.mrb[4].mxu1 %vm363_vm3, %v362_v4 }
 0x291   : > { %v747_v5 = vpop.f32.mrb[0].mxu1 }
 0x292   : > { %v448_v7 = vpop.f32.mrb[1].mxu1  ;;  %v481_v8 = vsel %vm477_vm4, %v747_v5, 0.0 }
 0x293   : > { %482 = vadd.xlane.f32.xlu1 %v481_v8  ;;  %v478_v13 = vsel %vm477_vm4, %v448_v7, 0.0 }
 0x294   : > { %479 = vadd.xlane.f32.xlu0 %v478_v13 }
 0x295   : > { %v750_v14 = vpop.f32.mrb[2].mxu1 }
 0x296   : > { %v458_v15 = vpop.f32.mrb[3].mxu1  ;;  %v487_v16 = vsel %vm477_vm4, %v750_v14, 0.0 }
 0x297   : > { %488 = vadd.xlane.f32.xlu1 %v487_v16  ;;  %v484_v21 = vsel %vm477_vm4, %v458_v15, 0.0 }
 0x298   : > { %485 = vadd.xlane.f32.xlu0 %v484_v21 }
 0x299   : > { %v753_v22 = vpop.f32.mrb[4].mxu1 }
 0x29a   : > { %v468_v23 = vpop.f32.mrb[5].mxu1  ;;  %v493_v24 = vsel %vm477_vm4, %v753_v22, 0.0 }
 0x29b   : > { %494 = vadd.xlane.f32.xlu1 %v493_v24  ;;  %v490_v25 = vsel %vm477_vm4, %v468_v23, 0.0 }
 0x29c   : > { %491 = vadd.xlane.f32.xlu0 %v490_v25 }
 0x320   : > { %v483_v27 = vpop.xlane.xlu1 %482 }
 0x321   : > { %v705_v28 = vmul.f32 -1.442695, %v483_v27  ;;  %v480_v29 = vpop.xlane.xlu0 %479 }
 0x322   : > { %v704_v30 = vmul.f32 -1.442695, %v480_v29 }
 0x323   : > { %823 = vpow2.f32 %v705_v28 }
 0x324   : > { %825 = vpow2.f32 %v704_v30  ;;  %v489_v31 = vpop.xlane.xlu1 %488 }
 0x325   : > { %v707_v32 = vmul.f32 -1.442695, %v489_v31  ;;  %v486_v33 = vpop.xlane.xlu0 %485 }
 0x326   : > { %v706_v34 = vmul.f32 -1.442695, %v486_v33 }
 0x327   : > { %827 = vpow2.f32 %v707_v32 }
 0x328   : > { %829 = vpow2.f32 %v706_v34  ;;  %v495_v35 = vpop.xlane.xlu1 %494 }
 0x329   : > { %v709_v36 = vmul.f32 -1.442695, %v495_v35  ;;  %v492_v37 = vpop.xlane.xlu0 %491 }
 0x32a   : > { %v708_v38 = vmul.f32 -1.442695, %v492_v37 }
 0x32b   : > { %831 = vpow2.f32 %v709_v36 }
 0x32c   : > { %833 = vpow2.f32 %v708_v38 }
 0x32d   : > { %v824_v39 = vpop.eup %823 }
 0x32e   : > { %v826_v40 = vpop.eup %825  ;;  %v515_v41 = vadd.f32 1.0, %v824_v39 }
 0x32f   : > { %v514_v42 = vadd.f32 1.0, %v826_v40 }
 0x330   : > { %835 = vrcp.f32 %v515_v41 }
 0x331   : > { %v828_v43 = vpop.eup %827  ;;  %837 = vrcp.f32 %v514_v42 }
 0x332   : > { %v830_v44 = vpop.eup %829  ;;  %v517_v45 = vadd.f32 1.0, %v828_v43 }
 0x333   : > { %v516_v46 = vadd.f32 1.0, %v830_v44 }
 0x334   : > { %839 = vrcp.f32 %v517_v45 }
 0x335   : > { %v832_v47 = vpop.eup %831  ;;  %841 = vrcp.f32 %v516_v46 }
 0x336   : > { %v834_v48 = vpop.eup %833  ;;  %v519_v50 = vadd.f32 1.0, %v832_v47 }
 0x337   : > { %v518_v49 = vadd.f32 1.0, %v834_v48 }
 0x339   : > { %843 = vrcp.f32 %v518_v49 }
 0x33a   : > { %v836_v52 = vpop.eup %835  ;;  %845 = vrcp.f32 %v519_v50 }
 0x33b   : > { %v838_v53 = vpop.eup %837  ;;  %v540_v54 = vmul.f32 %v836_v52, %v710_v51 }
 0x33c   : > { %v539_v55 = vmul.f32 %v838_v53, %v710_v51 }
 0x33d   : > { %v546_v56 = vadd.f32 1.0, %v540_v54 }
 0x33e   : > { %v840_v57 = vpop.eup %839  ;;  %v545_v58 = vadd.f32 1.0, %v539_v55 }
 0x33f   : > { %v842_v59 = vpop.eup %841  ;;  %558 = vperm.xlu1 %822, %v546_v56   ;;  %v542_v60 = vmul.f32 %v840_v57, %v710_v51 }
 0x340   : > { %553 = vperm.xlu0 %821, %v545_v58   ;;  %v541_v62 = vmul.f32 %v842_v59, %v710_v51 }
 0x341   : > { %v548_v61 = vadd.f32 1.0, %v542_v60 }
 0x342   : > { %v547_v4 = vadd.f32 1.0, %v541_v62 }
 0x343   : > { %v844_v63 = vpop.eup %843  ;;  %568 = vperm.xlu1 %822, %v548_v61  }
 0x344   : > { %v543_v0 = vmul.f32 %v844_v63, %v710_v51  ;;  %v846_v5 = vpop.eup %845 }
 0x345   : > { %v544_v8 = vmul.f32 %v846_v5, %v710_v51 }
 0x346   : > { %v549_v7 = vadd.f32 1.0, %v543_v0 }
 0x347   : > { %563 = vperm.xlu1 %822, %v547_v4   ;;  %v550_v13 = vadd.f32 1.0, %v544_v8 }
 0x34b   : > { %573 = vperm.xlu1 %822, %v549_v7  }
 0x34f   : > { %578 = vperm.xlu1 %822, %v550_v13  }
 0x3be   : > { %v559_v14 = vpop.permute.xlu1 %558 }
 0x3bf   : > { %v583_v15 = vmul.f32 %v559_v14, %v1095_v3  ;;  %v584_v16 = vmul.f32 %v559_v14, %v1101_v6  ;;  %v554_v21 = vpop.permute.xlu0 %553 }
 0x3c0   : > { %v581_v22 = vmul.f32 %v554_v21, %v1091_v1  ;;  %v582_v23 = vmul.f32 %v554_v21, %v1093_v2 }
 0x3c1   : > { %595 = vst [vmem:[%s217_s14 + $0x10] sm:$0xff] %v583_v15  ;;  %596 = vst [vmem:[%s217_s14 + $0x18] sm:$0xff] %v584_v16 }
 0x3c2   : > { %593 = vst [vmem:[%s217_s14] sm:$0xff] %v581_v22  ;;  %594 = vst [vmem:[%s217_s14 + $0x8] sm:$0xff] %v582_v23  ;;  %v569_v24 = vpop.permute.xlu1 %568 }
 0x3c3   : > { %v587_v25 = vmul.f32 %v569_v24, %v1111_v11  ;;  %v588_v26 = vmul.f32 %v569_v24, %v1113_v12 }
 0x3c5   : > { %599 = vst [vmem:[%s217_s14 + $0x30] sm:$0xff] %v587_v25  ;;  %600 = vst [vmem:[%s217_s14 + $0x38] sm:$0xff] %v588_v26 }
 0x3c6   : > { %v564_v3 = vpop.permute.xlu1 %563 }
 0x3c7   : > { %v585_v6 = vmul.f32 %v564_v3, %v1107_v9  ;;  %v586_v1 = vmul.f32 %v564_v3, %v1109_v10 }
 0x3c9   : > { %597 = vst [vmem:[%s217_s14 + $0x20] sm:$0xff] %v585_v6  ;;  %598 = vst [vmem:[%s217_s14 + $0x28] sm:$0xff] %v586_v1 }
 0x3ca   : > { %v574_v2 = vpop.permute.xlu1 %573 }
 0x3cb   : > { %v589_v27 = vmul.f32 %v574_v2, %v1123_v17  ;;  %v590_v28 = vmul.f32 %v574_v2, %v1125_v18 }
 0x3cd   : > { %601 = vst [vmem:[%s217_s14 + $0x40] sm:$0xff] %v589_v27  ;;  %602 = vst [vmem:[%s217_s14 + $0x48] sm:$0xff] %v590_v28 }
 0x3ce   : > { %v579_v11 = vpop.permute.xlu1 %578 }
 0x3cf   : > { %v591_v9 = vmul.f32 %v579_v11, %v1127_v19  ;;  %v592_v10 = vmul.f32 %v579_v11, %v1129_v20 }
 0x3d1   : > { %603 = vst [vmem:[%s217_s14 + $0x50] sm:$0xff] %v591_v9  ;;  %604 = vst [vmem:[%s217_s14 + $0x58] sm:$0xff] %v592_v10 }
 0x3d2   : > { %890 = shalt.err (!%p887_p2)
}
 0x3d3   : > { %s891_s23 = scalar_lea.hbm %s1194_s9, 1536  ;;  %s895_s30 = scalar_lea.hbm %s1246_s4, 3072 }
 0x3d4   : > { %p892_p4 = scmp.ne.s32.totalorder %s1194_s9, %s891_s23  ;;  %p896_p9 = scmp.lt.u32.totalorder %s1194_s9, %s1246_s4 }
 0x3d5   : > { %p897_p1 = scmp.lt.u32.totalorder %s895_s30, %s891_s23  ;;  %p899_p6 = scmp.lt.u32.totalorder %s891_s23, %s1194_s9 }
 0x3d6   : > { %p893_p5 = pnand %p892_p4, %p1252_p11 }
 0x3d7   : > { %p898_p3 = por %p897_p1, %p896_p9 }
 0x3d8   : > { %p894_p7 = pneg %p893_p5 }
 0x3d9   : > { %p900_p12 = por %p899_p6, %p898_p3 }
 0x3db   : > { %p901_p13 = pnand %p900_p12, %p894_p7 }
 0x3dd   : > { %904 = shalt.err (!%p901_p13)
}
 0x3de   : > { %s953_s7 = smov 256   ;;  %s954_s14 = smov 16  }
 0x3df   : > { %769 = dma.vmem_to_hbm [thread:$0]  (%p1252_p11), %s1196_s15, 1536, %s1194_s9, %s606_s3, %s953_s7, %s953_s7, %s954_s14  }
 0x3e0 PF: > { %s634_s13 = sand.u32 1, %s931_s17   ;;  %p1253_p8 = scmp.ne.s32.totalorder %s1250_s28, 0 }
 0x3e1   : > { %p1254_p10 = scmp.ge.s32.totalorder %s943_s20, 2  ;;  %s635_s26 = scalar_lea.sflag [#allocation5], %s634_s13 }
 0x3e3   : > { %p776_p0 = pnand %p1254_p10, %p1253_p8 }
 0x3e5   : > { %926 = dma.done.wait (!%p776_p0), %s635_s26, 1536  }
 0x3e6   : > { %928 = vsyncadd (!%p776_p0), %s635_s26, 4294965760  ;;  %p19_p2 = scmp.ge.s32.totalorder %s1008_s22, 4   ;;  %s1255_s17 = smov %s935_s18 }
 0x3e7   : > { %s1256_s18 = smov %s939_s19  ;;  %s1257_s19 = smov %s1020_s25 }
 0x3e8   : > { %s1258_s20 = smov %s1008_s22  ;;  %21 = sbr.rel (!%p19_p2) target bundleno = 8 (0x8), region = 81 }
 0x3ef   :  { %640 = vsyncpa [#allocation4], 1 }
 0x3f0   :  { %642 = vsyncpa [#allocation4 + $0x1], 1 }
 0x3f1   :  { %643 = vsyncpa [#allocation5], 1 }
 0x3f2   :  { %645 = vsyncpa [#allocation5 + $0x1], 1 }

</bundles_post_ra>
